<compile_context>
chip_gen: v6e
topology: v6e:2x2x1
jax: 0.10.0
libtpu: 0.0.40
codegen_flags: <defaults>
</compile_context>

<pallas_src>
import functools

import jax
import jax.numpy as jnp
from jax.experimental import pallas as pl
from jax.experimental.pallas import tpu as pltpu


def _fused_kernel(x_ref, w_ref, b_ref, o_ref, *, i_len, lw):
    # x_ref: (1, 1, 4*Cin, Lb)   bf16 parity-split, row-flattened input band
    # w_ref: (4, Cout_t, 4*Cin)  bf16 blurred (4x4/stride-2) weights, tap-major
    # b_ref: (Cout_t, 1)         f32 bias
    # o_ref: (1, 1, Cout_t, lw)  pooled output band ("wide" rows of Wo+1)
    acc = None
    for qy in range(2):
        for qx in range(2):
            t = qy * 2 + qx
            off = qy * i_len + qx          # static lane offset of this tap
            part = jnp.dot(w_ref[t], x_ref[0, 0, :, off:off + lw],
                           preferred_element_type=jnp.float32)
            acc = part if acc is None else acc + part
    # Pool weights sum to 1, so the bias survives the pool unchanged: add once.
    o_ref[0, 0] = (acc + b_ref[...]).astype(o_ref.dtype)


def _pick_block_h(ho, i_len, cin, ct, budget_bytes=12 * 1024 * 1024):
    """Largest divisor of Ho whose double-buffered working set fits budget."""
    best = 1
    for hb in range(1, ho + 1):
        if ho % hb:
            continue
        x_block = 4 * cin * (hb + 2) * i_len * 2     # bf16 input band
        o_block = ct * hb * i_len * 4                # f32 output band
        if 2 * x_block + 2 * o_block <= budget_bytes:
            best = hb
    return best


def conv_mean_pool(x, weight, bias, *, kernel_size=3, block_h=None,
                   compute_dtype=jnp.bfloat16):
    """ConvMeanPool forward. x: (N, Cin, H, W), weight: (Cout, Cin, 3, 3),
    bias: (Cout,). Returns (N, Cout, H//2, W//2) in x.dtype (NCHW)."""
    n, cin, h, w = x.shape
    cout = weight.shape[0]
    k = kernel_size
    assert k == 3, "NCSNv2 ConvMeanPool uses kernel_size=3"
    assert weight.shape == (cout, cin, k, k)
    assert h % 2 == 0 and w % 2 == 0, "2x2 mean-pool needs even spatial dims"

    ho, wo = h // 2, w // 2
    i_len = wo + 1          # wide row stride of the pooled grid (1 garbage col)
    j_len = ho + 2          # parity-image rows (incl. halo / extra pad rows)

    # ---- fold conv + 2x2 mean-pool into one 4x4 stride-2 kernel (wrapper) ----
    w32 = weight.astype(jnp.float32)
    w4 = jnp.zeros((cout, cin, 4, 4), jnp.float32)
    for a in (0, 1):
        for b in (0, 1):
            w4 = w4.at[:, :, a:a + 3, b:b + 3].add(w32)
    w4 = w4 * 0.25
    # (o, ci, u=2*qy+py, v=2*qx+px) -> tap-major (qy,qx) with K order (py,px,ci)
    wk = jnp.transpose(w4.reshape(cout, cin, 2, 2, 2, 2), (2, 4, 0, 3, 5, 1))
    wk = wk.reshape(4, cout, 4 * cin).astype(compute_dtype)
    b2 = bias.reshape(cout, 1).astype(jnp.float32)

    # ---- 2x2 space-to-depth (parity split) of the zero-padded input ----
    # pad=(1,3)/(1,1): one 'same'-conv halo on each side + 2 extra zero rows so
    # every tap's contiguous flat window stays in bounds.
    xp = jnp.pad(x.astype(compute_dtype), ((0, 0), (0, 0), (1, 3), (1, 1)))
    xq = xp.reshape(n, cin, j_len, 2, i_len, 2)
    xq = jnp.transpose(xq, (0, 3, 5, 1, 2, 4)).reshape(n, 4 * cin, j_len, i_len)

    # ---- Cout tile and H row-band sizes ----
    if cout % 256 == 0:
        ct = 256
    elif cout % 128 == 0:
        ct = 128
    else:
        ct = cout
    ncw = cout // ct

    if block_h is None:
        block_h = _pick_block_h(ho, i_len, cin, ct)
    assert ho % block_h == 0, "block_h must divide H//2"
    hb = block_h
    nb = ho // hb
    lw = hb * i_len                 # lanes of one output band (wide rows)
    lb = (hb + 2) * i_len           # lanes of one input band (with halo)

    # Duplicate the 2-parity-row halo host-side so every band is a plain,
    # non-overlapping BlockSpec window (overlap cost ~ (hb+2)/hb).
    xband = jnp.stack(
        [xq[:, :, b * hb: b * hb + hb + 2, :] for b in range(nb)], axis=1)
    xband = xband.reshape(n, nb, 4 * cin, lb)

    kernel = functools.partial(_fused_kernel, i_len=i_len, lw=lw)

    flops = 2 * n * cout * (16 * cin) * ho * i_len
    bytes_accessed = (xband.size * xband.dtype.itemsize
                      + wk.size * wk.dtype.itemsize
                      + b2.size * 4
                      + n * nb * cout * lw * 4)

    out_w = pl.pallas_call(
        kernel,
        out_shape=jax.ShapeDtypeStruct((n, nb, cout, lw), jnp.float32),
        grid_spec=pltpu.PrefetchScalarGridSpec(
            num_scalar_prefetch=0,
            grid=(n, nb, ncw),
            in_specs=[
                pl.BlockSpec((1, 1, 4 * cin, lb),
                             lambda bn, bb, bc: (bn, bb, 0, 0)),
                pl.BlockSpec((4, ct, 4 * cin),
                             lambda bn, bb, bc: (0, bc, 0)),
                pl.BlockSpec((ct, 1),
                             lambda bn, bb, bc: (bc, 0)),
            ],
            out_specs=pl.BlockSpec((1, 1, ct, lw),
                                   lambda bn, bb, bc: (bn, bb, bc, 0)),
        ),
        compiler_params=pltpu.CompilerParams(
            dimension_semantics=("parallel", "parallel", "parallel"),
            vmem_limit_bytes=48 * 1024 * 1024),
        cost_estimate=pl.CostEstimate(flops=flops, transcendentals=0,
                                      bytes_accessed=bytes_accessed),
    )(xband, wk, b2)

    # (N, nb, Cout, hb*(Wo+1)) -> (N, Cout, Ho, Wo): drop the garbage column.
    out = out_w.reshape(n, nb, cout, hb, i_len)
    out = jnp.transpose(out, (0, 2, 1, 3, 4)).reshape(n, cout, ho, i_len)
    return out[:, :, :, :wo].astype(x.dtype)


# ---------------- pure-JAX reference for verification ----------------
def _ref_forward(x, weight, bias):
    kh, kw = weight.shape[2], weight.shape[3]
    y = jax.lax.conv_general_dilated(
        x, weight, window_strides=(1, 1),
        padding=[(kh // 2, kh // 2), (kw // 2, kw // 2)],
        dimension_numbers=("NCHW", "OIHW", "NCHW"))
    y = y + bias.reshape(1, -1, 1, 1)
    return (y[:, :, ::2, ::2] + y[:, :, 1::2, ::2]
            + y[:, :, ::2, 1::2] + y[:, :, 1::2, 1::2]) / 4.0


if __name__ == "__main__":
    N, Cin, Cout, H, W = 2, 4, 8, 16, 16
    key = jax.random.PRNGKey(0)
    k1, k2, k3 = jax.random.split(key, 3)

    x = jax.random.normal(k1, (N, Cin, H, W), jnp.float32)
    weight = 0.1 * jax.random.normal(k2, (Cout, Cin, 3, 3), jnp.float32)
    bias = 0.1 * jax.random.normal(k3, (Cout,), jnp.float32)

    # block_h=4 -> 2 row-bands, exercising the (batch, band, cout) grid.
    out = jax.block_until_ready(conv_mean_pool(x, weight, bias, block_h=4))
    ref = jax.block_until_ready(_ref_forward(x, weight, bias))

    assert out.shape == (N, Cout, H // 2, W // 2), out.shape
    # bf16 operands / f32 accumulation -> looser tolerance than pure f32.
    assert jnp.allclose(out, ref, rtol=2e-2, atol=2e-2), \
        float(jnp.max(jnp.abs(out - ref)))
    print("KERNEL_OK")
</pallas_src>

<mosaic_0001>
module attributes {stable_mosaic.version = 11 : i64} {
  func.func @_fused_kernel(%arg0: i32, %arg1: i32, %arg2: i32, %arg3: memref<1x1x16x54xbf16, #tpu.memory_space<vmem>>, %arg4: memref<4x8x16xbf16, #tpu.memory_space<vmem>>, %arg5: memref<8x1xf32, #tpu.memory_space<vmem>>, %arg6: memref<1x1x8x36xf32, #tpu.memory_space<vmem>>) attributes {dimension_semantics = [#tpu.dimension_semantics<parallel>, #tpu.dimension_semantics<parallel>, #tpu.dimension_semantics<parallel>], iteration_bounds = array<i64: 2, 2, 1>, scalar_prefetch = 0 : i64, scratch_operands = 0 : i64, tpu.core_type = #tpu.core_type<tc>, window_params = [{transform_indices = @transform_0, window_bounds = array<i64: 1, 1, 16, 54>}, {transform_indices = @transform_1, window_bounds = array<i64: 4, 8, 16>}, {transform_indices = @transform_2, window_bounds = array<i64: 8, 1>}, {transform_indices = @transform_3, window_bounds = array<i64: 1, 1, 8, 36>}]} {
    %c0 = arith.constant 0 : index
    %c0_0 = arith.constant 0 : index
    %c0_1 = arith.constant 0 : index
    %0 = vector.load %arg4[%c0, %c0_0, %c0_1] : memref<4x8x16xbf16, #tpu.memory_space<vmem>>, vector<1x8x16xbf16>
    %1 = vector.shape_cast %0 : vector<1x8x16xbf16> to vector<8x16xbf16>
    %c0_2 = arith.constant 0 : index
    %c0_3 = arith.constant 0 : index
    %c0_4 = arith.constant 0 : index
    %c0_5 = arith.constant 0 : index
    %2 = vector.load %arg3[%c0_2, %c0_3, %c0_4, %c0_5] : memref<1x1x16x54xbf16, #tpu.memory_space<vmem>>, vector<1x1x16x36xbf16>
    %3 = vector.shape_cast %2 : vector<1x1x16x36xbf16> to vector<16x36xbf16>
    %cst = arith.constant dense<0.000000e+00> : vector<8x36xf32>
    %4 = tpu.matmul %1, %3, %cst {dimension_numbers = #tpu.dot_dimension_numbers<[1], [0], [0], [1], [0, 0, 1, 1], [], []>} : vector<8x16xbf16>, vector<16x36xbf16>, vector<8x36xf32> -> vector<8x36xf32>
    %c1 = arith.constant 1 : index
    %c0_6 = arith.constant 0 : index
    %c0_7 = arith.constant 0 : index
    %5 = vector.load %arg4[%c1, %c0_6, %c0_7] : memref<4x8x16xbf16, #tpu.memory_space<vmem>>, vector<1x8x16xbf16>
    %6 = vector.shape_cast %5 : vector<1x8x16xbf16> to vector<8x16xbf16>
    %c0_8 = arith.constant 0 : index
    %c0_9 = arith.constant 0 : index
    %c0_10 = arith.constant 0 : index
    %c1_11 = arith.constant 1 : index
    %7 = vector.load %arg3[%c0_8, %c0_9, %c0_10, %c1_11] : memref<1x1x16x54xbf16, #tpu.memory_space<vmem>>, vector<1x1x16x36xbf16>
    %8 = vector.shape_cast %7 : vector<1x1x16x36xbf16> to vector<16x36xbf16>
    %cst_12 = arith.constant dense<0.000000e+00> : vector<8x36xf32>
    %9 = tpu.matmul %6, %8, %cst_12 {dimension_numbers = #tpu.dot_dimension_numbers<[1], [0], [0], [1], [0, 0, 1, 1], [], []>} : vector<8x16xbf16>, vector<16x36xbf16>, vector<8x36xf32> -> vector<8x36xf32>
    %10 = arith.addf %4, %9 : vector<8x36xf32>
    %c2 = arith.constant 2 : index
    %c0_13 = arith.constant 0 : index
    %c0_14 = arith.constant 0 : index
    %11 = vector.load %arg4[%c2, %c0_13, %c0_14] : memref<4x8x16xbf16, #tpu.memory_space<vmem>>, vector<1x8x16xbf16>
    %12 = vector.shape_cast %11 : vector<1x8x16xbf16> to vector<8x16xbf16>
    %c0_15 = arith.constant 0 : index
    %c0_16 = arith.constant 0 : index
    %c0_17 = arith.constant 0 : index
    %c9 = arith.constant 9 : index
    %13 = vector.load %arg3[%c0_15, %c0_16, %c0_17, %c9] : memref<1x1x16x54xbf16, #tpu.memory_space<vmem>>, vector<1x1x16x36xbf16>
    %14 = vector.shape_cast %13 : vector<1x1x16x36xbf16> to vector<16x36xbf16>
    %cst_18 = arith.constant dense<0.000000e+00> : vector<8x36xf32>
    %15 = tpu.matmul %12, %14, %cst_18 {dimension_numbers = #tpu.dot_dimension_numbers<[1], [0], [0], [1], [0, 0, 1, 1], [], []>} : vector<8x16xbf16>, vector<16x36xbf16>, vector<8x36xf32> -> vector<8x36xf32>
    %16 = arith.addf %10, %15 : vector<8x36xf32>
    %c3 = arith.constant 3 : index
    %c0_19 = arith.constant 0 : index
    %c0_20 = arith.constant 0 : index
    %17 = vector.load %arg4[%c3, %c0_19, %c0_20] : memref<4x8x16xbf16, #tpu.memory_space<vmem>>, vector<1x8x16xbf16>
    %18 = vector.shape_cast %17 : vector<1x8x16xbf16> to vector<8x16xbf16>
    %c0_21 = arith.constant 0 : index
    %c0_22 = arith.constant 0 : index
    %c0_23 = arith.constant 0 : index
    %c10 = arith.constant 10 : index
    %19 = vector.load %arg3[%c0_21, %c0_22, %c0_23, %c10] : memref<1x1x16x54xbf16, #tpu.memory_space<vmem>>, vector<1x1x16x36xbf16>
    %20 = vector.shape_cast %19 : vector<1x1x16x36xbf16> to vector<16x36xbf16>
    %cst_24 = arith.constant dense<0.000000e+00> : vector<8x36xf32>
    %21 = tpu.matmul %18, %20, %cst_24 {dimension_numbers = #tpu.dot_dimension_numbers<[1], [0], [0], [1], [0, 0, 1, 1], [], []>} : vector<8x16xbf16>, vector<16x36xbf16>, vector<8x36xf32> -> vector<8x36xf32>
    %22 = arith.addf %16, %21 : vector<8x36xf32>
    %c0_25 = arith.constant 0 : index
    %c0_26 = arith.constant 0 : index
    %23 = vector.load %arg5[%c0_25, %c0_26] : memref<8x1xf32, #tpu.memory_space<vmem>>, vector<8x1xf32>
    %24 = vector.broadcast %23 : vector<8x1xf32> to vector<8x36xf32>
    %25 = arith.addf %22, %24 : vector<8x36xf32>
    %c0_27 = arith.constant 0 : index
    %c0_28 = arith.constant 0 : index
    %c0_29 = arith.constant 0 : index
    %c0_30 = arith.constant 0 : index
    %26 = vector.load %arg6[%c0_27, %c0_28, %c0_29, %c0_30] : memref<1x1x8x36xf32, #tpu.memory_space<vmem>>, vector<1x1x8x36xf32>
    %27 = vector.shape_cast %26 : vector<1x1x8x36xf32> to vector<8x36xf32>
    %28 = vector.shape_cast %25 : vector<8x36xf32> to vector<1x1x8x36xf32>
    tpu.vector_store %arg6[%c0_27, %c0_28, %c0_29, %c0_30], %28 {strides = array<i32>} : memref<1x1x8x36xf32, #tpu.memory_space<vmem>>, vector<1x1x8x36xf32>,
    return
  }
  func.func @transform_0(%arg0: i32, %arg1: i32, %arg2: i32) -> (i32, i32, i32, i32) {
    %c0_i32 = arith.constant 0 : i32
    %c0_i32_0 = arith.constant 0 : i32
    %c0_i32_1 = arith.constant 0 : i32
    return %arg0, %arg1, %c0_i32, %c0_i32_0 : i32, i32, i32, i32
  }
  func.func @transform_1(%arg0: i32, %arg1: i32, %arg2: i32) -> (i32, i32, i32) {
    %c0_i32 = arith.constant 0 : i32
    %c0_i32_0 = arith.constant 0 : i32
    %c0_i32_1 = arith.constant 0 : i32
    return %c0_i32, %arg2, %c0_i32_0 : i32, i32, i32
  }
  func.func @transform_2(%arg0: i32, %arg1: i32, %arg2: i32) -> (i32, i32) {
    %c0_i32 = arith.constant 0 : i32
    %c0_i32_0 = arith.constant 0 : i32
    return %arg2, %c0_i32 : i32, i32
  }
  func.func @transform_3(%arg0: i32, %arg1: i32, %arg2: i32) -> (i32, i32, i32, i32) {
    %c0_i32 = arith.constant 0 : i32
    %c0_i32_0 = arith.constant 0 : i32
    return %arg0, %arg1, %arg2, %c0_i32 : i32, i32, i32, i32
  }
}

</mosaic_0001>

<bundles_post_ra>
// kernel: tpu_custom_call.1
= control target key start
LH: loop header
LB: loop body
LE: loop exit
PB: predicated region body
PF: predicated region fallthrough
CT: control target
= control target key end

     0   :  { %s1151_s0 = inlined_call_operand.hbm [shape: bf16[2,2,16,54], index: 0, kind: input, shape index: {}]   ;;  %s1152_s1 = inlined_call_operand.hbm [shape: bf16[4,8,16], index: 1, kind: input, shape index: {}]   ;;  %s1153_s2 = inlined_call_operand.vmem [shape: f32[8,1], index: 2, kind: input, shape index: {}]   ;;  %s1154_s3 = inlined_call_operand.hbm [shape: f32[2,2,8,36], index: 3, kind: output, shape index: {}]  }
   0x1   :  { %1162 = sst [smem:[#allocation15_spill]] %s1152_s1 }
   0x2   :  { %8 = vsyncpa [#allocation3], 0 }
   0x3   :  { %10 = vsyncpa [#allocation3 + $0x1], 0 }
   0x4   :  { %11 = vsyncpa [#allocation6], 0 }
   0x5   :  { %12 = vsyncpa [#allocation4], 0 }
   0x6   :  { %14 = vsyncpa [#allocation4 + $0x1], 0  ;;  %s941_s12 = smov 0   ;;  %s943_s13 = smov 0  }
   0x7   :  { %s945_s14 = smov 0   ;;  %s947_s15 = smov 0  }
   0x8   :  { %s949_s16 = smov 0   ;;  %s951_s17 = smov 0  }
   0x9   :  { %s953_s18 = smov 0   ;;  %s955_s19 = smov 0  }
   0xa LB: > { %1163 = sst [smem:[#allocation11_spill]] %s880_s12  ;;  %s598_s20 = sadd.s32 4294967295, %s908_s19   ;;  %s908_s19 = sphi %s955_s19, %s20_s19   ;;  %s904_s18 = sphi %s953_s18, %s1188_s18   ;;  %s900_s17 = sphi %s951_s17, %s1183_s17   ;;  %s896_s16 = sphi %s949_s16, %s1187_s16   ;;  %s892_s15 = sphi %s947_s15, %s1182_s15   ;;  %s888_s14 = sphi %s945_s14, %s1186_s14   ;;  %s884_s13 = sphi %s943_s13, %s1185_s13   ;;  %s880_s12 = sphi %s941_s12, %s1184_s12  }
   0xb   : > { %1164 = sst [smem:[#allocation12_spill]] %s900_s17  ;;  %s599_s21 = sadd.s32 4294967294, %s908_s19  }
   0xc   : > { %p61_p0 = scmp.ne.s32.totalorder %s884_s13, %s880_s12  ;;  %p985_p1 = scmp.eq.s32.totalorder %s598_s20, 0 }
   0xd   : > { %p989_p2 = scmp.eq.s32.totalorder %s598_s20, 3  ;;  %p147_p3 = scmp.eq.s32.totalorder %s599_s21, 3 }
   0xe   : > { %p995_p4 = por %p985_p1, %p61_p0  ;;  %p600_p5 = scmp.ge.s32.totalorder %s908_s19, 1 }
   0xf   : > { %p1000_p6 = por %p147_p3, %p61_p0  ;;  %p154_p7 = scmp.lt.s32.totalorder %s908_s19, 5 }
  0x10   : > { %s1167_s24 = scalar_select %p995_p4, 1, 0 }
  0x11   : > { %s1168_s25 = scalar_select %p1000_p6, 1, 0 }
  0x12   : > { %p1005_p8 = pnand %p600_p5, %p154_p7  ;;  %s910_s27 = smov [#allocation5]  }
  0x13   : > { %1169 = sst [smem:[#allocation13_spill]] %s1168_s25  ;;  %s168_s28 = sshll.u32 %s910_s27, 4  ;;  %s169_s28 = int_to_ptr.vmem [resolvable:$true] %s168_s28 }
  0x14   : > { %p662_p9 = pneg %p1005_p8  ;;  %s765_s29 = scalar_lea.vmem %s169_s28, 256 }
  0x15   : > { %p766_p12 = scmp.ne.s32.totalorder %s169_s28, %s765_s29  ;;  %p773_p3 = scmp.lt.s32.totalorder %s169_s28, %s169_s28 }
  0x16   : > { %p663_p10 = pnand %p662_p9, %p985_p1  ;;  %p774_p6 = scmp.lt.s32.totalorder %s765_s29, %s765_s29 }
  0x18   : > { %p756_p11 = pneg %p663_p10  ;;  %p775_p4 = por %p774_p6, %p773_p3 }
  0x1a   : > { %p768_p13 = pnand %p766_p12, %p756_p11 }
  0x1c   : > { %p769_p0 = pneg %p768_p13 }
  0x1e   : > { %p776_p5 = pnand %p775_p4, %p769_p0 }
  0x20   : > { %779 = shalt.err (!%p776_p5)
}
  0x21   : > { %s1156_s30 = smov 64   ;;  %s1157_s4 = smov 4  }
  0x22   : > { %s1171_s1 = sld [smem:[#allocation15_spill]]  ;;  %s35_s7 = sadd.s32 1, %s900_s17 }
  0x23   : > { %p37_p4 = scmp.ge.s32.totalorder %s35_s7, 2  ;;  %s39_s8 = sadd.s32 1, %s904_s18 }
  0x24   : > { %s48_s9 = sadd.s32 1, %s888_s14  ;;  %p55_p6 = scmp.ne.s32.totalorder %s888_s14, %s884_s13 }
  0x25   : > { %s1190_s7 = smov (%p37_p4, %s35_s7), 0  ;;  %s1192_s8 = smov (!%p37_p4, %s39_s8), %s904_s18 }
  0x26   : > { %1172 = sst [smem:[#allocation14_spill]] %s1190_s7  ;;  %s44_s10 = ssub.s32 %s900_s17, %s1190_s7 }
  0x27   : > { %p56_p7 = scmp.eq.s32.totalorder %s908_s19, 0  ;;  %p41_p9 = scmp.ge.s32.totalorder %s1192_s8, 2 }
  0x28   : > { %665 = dma.hbm_to_vmem [thread:$0]  (!%p663_p10), %s1171_s1, 256, %s169_s28, [#allocation6], %s1156_s30, %s1156_s30, %s1157_s4  }
  0x29   : > { %p1032_p11 = por %p989_p2, %p55_p6  ;;  %p1036_p10 = por %p56_p7, %p55_p6 }
  0x2a   : > { %p675_p12 = scmp.lt.s32.totalorder %s908_s19, 4  ;;  %s1194_s8 = smov (%p41_p9, %s1192_s8), 0 }
  0x2b   : > { %s189_s21 = sand.u32 1, %s888_s14   ;;  %s605_s27 = sshll.u32 %s900_s17, 1 }
  0x2c   : > { %s43_s28 = ssub.s32 %s904_s18, %s1194_s8  ;;  %s604_s5 = sshll.u32 %s189_s21, 3 }
  0x2d   : > { %s45_s29 = sor.u32 %s44_s10, %s43_s28  ;;  %s606_s23 = sshll.u32 %s904_s18, 2 }
  0x2e   : > { %p46_p13 = scmp.eq.s32.totalorder %s45_s29, 0  ;;  %s193_s6 = scalar_lea.vmem [#allocation2], %s604_s5 }
  0x2f   : > { %s202_s30 = sshll.u32 %s193_s6, 4  ;;  %s199_s1 = sadd.s32 %s606_s23, %s605_s27  ;;  %s203_s30 = int_to_ptr.vmem [resolvable:$true] %s202_s30 }
  0x30   : > { %s1049_s4 = scalar_select %p46_p13, %s888_s14, %s48_s9  }
  0x31   : > { %s607_s7 = sshll.u32 %s199_s1, 6  ;;  %p1055_p2 = pnand %p675_p12, %p1036_p10 }
  0x32   : > { %s201_s10 = scalar_lea.hbm %s1151_s0, %s607_s7  ;;  %s190_s28 = scalar_lea.sflag [#allocation3], %s189_s21 }
  0x33   : > { %p782_p0 = pneg %p1055_p2  ;;  %s793_s29 = scalar_lea.vmem %s203_s30, 128 }
  0x34   : > { %p794_p3 = scmp.ne.s32.totalorder %s203_s30, %s793_s29  ;;  %s913_s9 = smov [#allocation2]  }
  0x35   : > { %s798_s1 = sshll.u32 %s913_s9, 4  ;;  %s799_s1 = int_to_ptr.vmem [resolvable:$false] %s798_s1 }
  0x36   : > { %p796_p5 = pnand %p794_p3, %p782_p0  ;;  %s800_s20 = scalar_lea.vmem %s799_s1, 256 }
  0x37   : > { %p801_p6 = scmp.lt.s32.totalorder %s203_s30, %s799_s1  ;;  %p802_p7 = scmp.lt.s32.totalorder %s800_s20, %s793_s29 }
  0x38   : > { %p797_p4 = pneg %p796_p5 }
  0x39   : > { %p803_p9 = por %p802_p7, %p801_p6 }
  0x3b   : > { %p804_p10 = pnand %p803_p9, %p797_p4 }
  0x3d   : > { %807 = shalt.err (!%p804_p10)
}
  0x3e   : > { %s1176_s12 = smov 4   ;;  %s1177_s17 = smov 64  }
  0x3f   : > { %669 = dma.hbm_to_vmem [thread:$0]  (!%p1055_p2), %s201_s10, 128, %s203_s30, %s190_s28, %s1177_s17, %s1177_s17, %s1176_s12  }
  0x40   : > { %214 = sbr.rel (%p1005_p8) target bundleno = 414 (0x19e), region = 32  ;;  %s1072_s7 = sand.u32 (!%p1005_p8), 1, %s884_s13  }
  0x41   : > { %s609_s21 = sshll.u32 (!%p1005_p8), %s1072_s7, 3  ;;  %s217_s27 = scalar_lea.sflag (!%p1005_p8), [#allocation3], %s1072_s7 }
  0x42   : > { %s220_s5 = scalar_lea.vmem (!%p1005_p8), [#allocation2], %s609_s21  ;;  %p1178_p12 = scmp.ne.s32.totalorder (!%p1005_p8), %s1167_s24, 0 }
  0x45   : > { %867 = dma.done.wait (%p1178_p12), %s217_s27, 128  }
  0x46   : > { %869 = vsyncadd (%p1178_p12), %s217_s27, 4294967168 }
  0x47   : > { %871 = dma.done.wait (%p985_p1), [#allocation6], 256  }
  0x48   : > { %873 = vsyncadd (%p985_p1), [#allocation6], 4294967040  ;;  %v914_v0 = vmov 0.0   ;;  %vm915_vm0 = vmmov 0   ;;  %v753_v1 = vld [vmem:[%s220_s5] sm:$0xff]   ;;  %v916_v2 = vmov 0  }
  0x49   : > { %636 = vmatprep.subr.bf16.mxu1 %v914_v0  ;;  %630 = vmatprep.subr.bf16.mxu0 %v914_v0  ;;  %s917_s24 = smov 127   ;;  %s918_s25 = smov 118   ;;  %v256_v3 = vld [vmem:[#allocation5] sm:$0xf]  ;;  %vm269_vm1 = vcmask 130048   ;;  %v455_v4 = vld [vmem:[%s1153_s2] sm:$0xff] }
  0x4a   : > { %638 = vmatprep.mubr.msk.bf16.mxu1 %vm915_vm0, %v914_v0  ;;  %632 = vmatprep.mubr.msk.bf16.mxu0 %vm915_vm0, %v914_v0  ;;  %s919_s30 = smov 119   ;;  %v260_v7 = vld [vmem:[#allocation5 + $0x4] sm:$0xf]  ;;  %v407_v8 = vld [vmem:[#allocation5 + $0xc] sm:$0xf]  ;;  %s618_s23 = sshll.u32 %s896_s16, 1 }
  0x4b   : > { %751 = vset.pattern.permute.xlu1 %v916_v2  ;;  %752 = vset.pattern.permute.xlu0 %v916_v2  ;;  %v358_v10 = vld [vmem:[#allocation5 + $0x8] sm:$0xf]  ;;  %s477_s6 = sadd.s32 %s892_s15, %s618_s23  ;;  %s250_s28 = scalar_lea.vmem [#allocation7], %s609_s21  ;;  %vm462_vm2 = vcmask 293888  }
  0x4c   : > { %266 = vrot.lane.b32.xlu0 %v753_v1, %s917_s24  ;;  %408 = vrot.lane.b32.xlu1 %v753_v1, %s918_s25  ;;  %s619_s10 = sshll.u32 %s477_s6, 7  ;;  %s481_s29 = sshll.u32 %s250_s28, 4  ;;  %s482_s29 = int_to_ptr.vmem [resolvable:$true] %s481_s29 }
  0x4d   : > { %637 = vmatpush3.bf16.msra.mxu1 %v753_v1  ;;  %s1104_s1 = scalar_lea.hbm %s1154_s3, %s619_s10  ;;  %s465_s15 = scalar_lea.sflag [#allocation4], %s1072_s7 }
  0x4e   : > { %648 = vmatprep.subr.bf16.mxu1 %v914_v0  ;;  %s808_s20 = scalar_lea.vmem %s482_s29, 128  ;;  %s920_s12 = smov [#allocation7]  }
  0x4f   : > { %p809_p1 = scmp.ne.s32.totalorder %s482_s29, %s808_s20  ;;  %s812_s17 = sshll.u32 %s920_s12, 4  ;;  %s813_s17 = int_to_ptr.vmem [resolvable:$false] %s812_s17 }
  0x50   : > { %359 = vrot.lane.b32.xlu0 %v753_v1, %s919_s30  ;;  %639 = vmatmul.mubr.msk.bf16.vlgmr.msra.gmra.mxu1 %vm269_vm1, %v256_v3  ;;  %s814_s21 = scalar_lea.vmem %s813_s17, 256  ;;  %p815_p2 = scmp.lt.s32.totalorder %s482_s29, %s813_s17 }
  0x51   : > { %650 = vmatprep.mubr.msk.bf16.mxu1 %vm915_vm0, %v914_v0  ;;  %458 = vperm.xlu1 %751, %v455_v4   ;;  %p810_p8 = pnand %p809_p1, %p1032_p11  ;;  %p816_p0 = scmp.lt.s32.totalorder %s814_s21, %s808_s20 }
  0x53   : > { %p811_p13 = pneg %p810_p8  ;;  %p817_p3 = por %p816_p0, %p815_p2 }
  0x55   : > { %p818_p5 = pnand %p817_p3, %p811_p13 }
  0xbe   : > { %v267_v5 = vpop.permute.xlu0 %266  ;;  %v409_v6 = vpop.permute.xlu1 %408 }
  0xbf   : > { %631 = vmatpush3.bf16.msra.mxu0 %v267_v5  ;;  %649 = vmatpush3.bf16.msra.mxu1 %v409_v6 }
  0xc0   : > { %642 = vmatprep.subr.bf16.mxu0 %v914_v0 }
  0xc2   : > { %633 = vmatmul.mubr.msk.bf16.vlgmr.msra.gmra.mxu0 %vm269_vm1, %v260_v7  ;;  %v360_v9 = vpop.permute.xlu0 %359  ;;  %651 = vmatmul.mubr.msk.bf16.vlgmr.msra.gmra.mxu1 %vm269_vm1, %v407_v8 }
  0xc3   : > { %643 = vmatpush3.bf16.msra.mxu0 %v360_v9  ;;  %644 = vmatprep.mubr.msk.bf16.mxu0 %vm915_vm0, %v914_v0 }
  0xca   : > { %645 = vmatmul.mubr.msk.bf16.vlgmr.msra.gmra.mxu0 %vm269_vm1, %v358_v10 }
  0xcc   : > { %v459_v27 = vpop.permute.xlu1 %458 }
 0x110   : > { %v351_v11 = vpop.f32.mrf.mxu1 }
 0x112   : > { %v640_v12 = vpop.f32.mrf.mxu1 }
 0x114   : > { %v354_v13 = vpop.f32.mrf.mxu1 }
 0x116   : > { %v641_v14 = vpop.f32.mrf.mxu1 }
 0x182   : > { %v307_v15 = vpop.f32.mrf.mxu0  ;;  %v448_v16 = vpop.f32.mrf.mxu1 }
 0x183   : > { %v352_v23 = vadd.f32 %v351_v11, %v307_v15 }
 0x184   : > { %v634_v17 = vpop.f32.mrf.mxu0  ;;  %v652_v18 = vpop.f32.mrf.mxu1 }
 0x186   : > { %v310_v19 = vpop.f32.mrf.mxu0  ;;  %v451_v20 = vpop.f32.mrf.mxu1 }
 0x188   : > { %v635_v21 = vpop.f32.mrf.mxu0  ;;  %v653_v22 = vpop.f32.mrf.mxu1 }
 0x18a   : > { %v399_v24 = vpop.f32.mrf.mxu0 }
 0x18b   : > { %v405_v25 = vadd.f32 %v399_v24, %v352_v23 }
 0x18c   : > { %v646_v26 = vpop.f32.mrf.mxu0 }
 0x18d   : > { %v454_v28 = vadd.f32 %v448_v16, %v405_v25 }
 0x18e   : > { %v402_v29 = vpop.f32.mrf.mxu0 }
 0x18f   : > { %v461_v30 = vadd.f32 %v459_v27, %v454_v28 }
 0x190   : > { %v647_v31 = vpop.f32.mrf.mxu0 }
 0x191   : > { %463 = vst.msk [vmem:[%s250_s28] sm:$0xff] %vm462_vm2, %v461_v30 }
 0x192   : > { %821 = shalt.err (!%p818_p5)
}
 0x193   : > { %s822_s27 = scalar_lea.hbm %s1104_s1, 128  ;;  %s826_s24 = scalar_lea.hbm %s1154_s3, 512 }
 0x194   : > { %p823_p4 = scmp.ne.s32.totalorder %s1104_s1, %s822_s27  ;;  %p827_p9 = scmp.lt.s32.totalorder %s1104_s1, %s1154_s3 }
 0x195   : > { %p828_p10 = scmp.lt.s32.totalorder %s826_s24, %s822_s27 }
 0x196   : > { %p824_p6 = pnand %p823_p4, %p1032_p11 }
 0x197   : > { %p829_p12 = por %p828_p10, %p827_p9 }
 0x198   : > { %p825_p7 = pneg %p824_p6 }
 0x19a   : > { %p830_p1 = pnand %p829_p12, %p825_p7 }
 0x19c   : > { %833 = shalt.err (!%p830_p1)
}
 0x19d   : > { %660 = dma.vmem_to_hbm [thread:$0]  (%p1032_p11), %s482_s29, 128, %s1104_s1, %s465_s15  }
 0x19e PF: > { %s1179_s26 = sld [smem:[#allocation11_spill]]  ;;  %p677_p8 = scmp.ge.s32.totalorder %s908_s19, 2 }
 0x19f   : > { %s1180_s30 = sld [smem:[#allocation13_spill]] }
 0x1a4   : > { %s493_s23 = sand.u32 1, %s1179_s26  }
 0x1a5   : > { %p1181_p13 = scmp.ne.s32.totalorder %s1180_s30, 0  ;;  %s494_s6 = scalar_lea.sflag [#allocation4], %s493_s23 }
 0x1a7   : > { %p671_p2 = pnand %p677_p8, %p1181_p13 }
 0x1a9   : > { %p672_p0 = pneg %p671_p2 }
 0x1ab   : > { %875 = dma.done.wait (%p672_p0), %s494_s6, 128  }
 0x1ac   : > { %877 = vsyncadd (%p672_p0), %s494_s6, 4294967168  ;;  %s20_s19 = sadd.s32 1, %s908_s19   ;;  %s1182_s15 = sld [smem:[#allocation12_spill]] }
 0x1ad   : > { %p17_p3 = scmp.ge.s32.totalorder %s20_s19, 6   ;;  %s1183_s17 = sld [smem:[#allocation14_spill]] }
 0x1ae   : > { %s1184_s12 = smov %s884_s13  ;;  %s1185_s13 = smov %s888_s14 }
 0x1af   : > { %s1186_s14 = smov %s1049_s4  ;;  %s1187_s16 = smov %s904_s18 }
 0x1b0   : > { %s1188_s18 = smov %s1194_s8  ;;  %19 = sbr.rel (!%p17_p3) target bundleno = 10 (0xa), region = 88 }
 0x1b5   :  { %499 = vsyncpa [#allocation3], 1 }
 0x1b6   :  { %501 = vsyncpa [#allocation3 + $0x1], 1 }
 0x1b7   :  { %502 = vsyncpa [#allocation6], 1 }
 0x1b8   :  { %503 = vsyncpa [#allocation4], 1 }
 0x1b9   :  { %505 = vsyncpa [#allocation4 + $0x1], 1 }

</bundles_post_ra>
